<compile_context>
chip_gen: v7x
topology: tpu7x:2x2x1
jax: 0.10.0
libtpu: 0.0.40
codegen_flags: <defaults>
</compile_context>

<pallas_src>
import math

import jax
import jax.numpy as jnp
from jax import lax
from jax.experimental import pallas as pl
from jax.experimental.pallas import tpu as pltpu


def stochastic_linear_kernel(x_ref, wmu_ref, wlv_ref, bmu_ref, blv_ref,
                             noise_ref, out_ref, acc_var):
    """Grid = (M/TM, N/TN, K/TK); K innermost (reduction, 'arbitrary').

    x_ref:   (TM, TK)   activations
    wmu_ref: (TN, TK)   w_mu in native (out_dim, in_dim) layout
    wlv_ref: (TN, TK)   w_log_var (raw; exp fused here)
    bmu_ref: (1, TN)    b_mu
    blv_ref: (1, TN)    b_log_var (raw; exp fused here)
    noise:   (TM, TN)
    out_ref: (TM, TN)   f32, doubles as the mean accumulator (resident over K)
    acc_var: (TM, TN)   f32 scratch, variance accumulator
    """
    k = pl.program_id(2)
    dn = (((1,), (1,)), ((), ()))  # contract last dim of x with last dim of W

    x = x_ref[...]                                       # (TM, TK)
    # Mean path: x @ W_mu^T (native-layout weights, no wrapper transpose).
    mean_part = lax.dot_general(x, wmu_ref[...], dn,
                                preferred_element_type=jnp.float32)
    # Variance path: (x*x) @ exp(W_log_var)^T; exp fused (EUP slot, ~free).
    w_var = jnp.exp(wlv_ref[...])
    var_part = lax.dot_general(x * x, w_var, dn,
                               preferred_element_type=jnp.float32)

    @pl.when(k == 0)
    def _init():
        out_ref[...] = mean_part
        acc_var[...] = var_part

    @pl.when(k > 0)
    def _accumulate():
        out_ref[...] += mean_part
        acc_var[...] += var_part

    @pl.when(k == pl.num_programs(2) - 1)
    def _finalize():
        out_mean = out_ref[...] + bmu_ref[...]                       # (TM,TN)+(1,TN)
        out_var = jnp.maximum(acc_var[...] + jnp.exp(blv_ref[...]), 0.0)   # F.relu
        out_ref[...] = out_mean + noise_ref[...] * jnp.sqrt(out_var)


def _round_up(v, m):
    return (v + m - 1) // m * m


def stochastic_linear_forward(x, w_mu, w_log_var, b_mu, b_log_var, noise, *,
                              tm_cap=512, tn_cap=512, tk_cap=1024,
                              compute_dtype=jnp.float32):
    """x: (B, in_dim); w_*: (out_dim, in_dim); b_*: (out_dim,); noise: (B, out_dim).

    compute_dtype=jnp.bfloat16 halves the x/weight HBM streams and runs the MXU
    at full bf16 rate (f32 accumulation kept); use f32 for exact semantics.
    """
    B, in_dim = x.shape
    out_dim = w_mu.shape[0]

    # Tile sizes: sublane-aligned M (8), lane-aligned N/K (128); large caps to
    # amortize per-grid-step overhead, still far under the 48 MiB VMEM budget.
    tm = min(tm_cap, _round_up(B, 8))
    tn = min(tn_cap, _round_up(out_dim, 128))
    tk = min(tk_cap, _round_up(in_dim, 128))
    m_pad = _round_up(B, tm)
    n_pad = _round_up(out_dim, tn)
    # v7x has 2 TensorCores: if M collapses to one block, split the N axis so
    # the "parallel" grid still has >=2 blocks (harmless on v5e/v6e).
    if m_pad // tm == 1 and n_pad // tn == 1 and tn >= 256 and tn % 256 == 0:
        tn //= 2
        n_pad = _round_up(out_dim, tn)
    k_pad = _round_up(in_dim, tk)

    def pad2(a, rows, cols):
        return jnp.pad(a, ((0, rows - a.shape[0]), (0, cols - a.shape[1])))

    # Zero K-padding of x guarantees padded columns contribute nothing to
    # either dot (regardless of weight-pad values, incl. exp(0)=1).
    x_p = pad2(x, m_pad, k_pad).astype(compute_dtype)
    wmu_p = pad2(w_mu, n_pad, k_pad).astype(compute_dtype)          # native (N, K)
    wlv_p = pad2(w_log_var, n_pad, k_pad).astype(compute_dtype)     # raw log-var
    bmu_p = pad2(b_mu.reshape(1, out_dim), 1, n_pad)                 # f32 (tiny)
    blv_p = pad2(b_log_var.reshape(1, out_dim), 1, n_pad)            # f32 (tiny)
    noise_p = pad2(noise, m_pad, n_pad)                              # f32

    grid = (m_pad // tm, n_pad // tn, k_pad // tk)

    out_padded = pl.pallas_call(
        stochastic_linear_kernel,
        out_shape=jax.ShapeDtypeStruct((m_pad, n_pad), jnp.float32),
        grid_spec=pltpu.PrefetchScalarGridSpec(
            num_scalar_prefetch=0,
            grid=grid,
            in_specs=[
                pl.BlockSpec((tm, tk), lambda i, j, k: (i, k)),   # x
                pl.BlockSpec((tn, tk), lambda i, j, k: (j, k)),   # w_mu (N,K)
                pl.BlockSpec((tn, tk), lambda i, j, k: (j, k)),   # w_log_var (N,K)
                pl.BlockSpec((1, tn), lambda i, j, k: (0, j)),    # b_mu
                pl.BlockSpec((1, tn), lambda i, j, k: (0, j)),    # b_log_var
                pl.BlockSpec((tm, tn), lambda i, j, k: (i, j)),   # noise
            ],
            out_specs=pl.BlockSpec((tm, tn), lambda i, j, k: (i, j)),
            scratch_shapes=[pltpu.VMEM((tm, tn), jnp.float32)],   # var accumulator
        ),
        compiler_params=pltpu.CompilerParams(
            dimension_semantics=("parallel", "parallel", "arbitrary"),
            # 48 MiB leaves headroom on v7x (64 MiB physical VMEM); v6e/v5e
            # could raise this further if tiles are grown beyond the defaults.
            vmem_limit_bytes=48 * 1024 * 1024,
        ),
    )(x_p, wmu_p, wlv_p, bmu_p, blv_p, noise_p)

    return out_padded[:B, :out_dim]


def init_stochastic_linear_params(key, in_dim, out_dim,
                                  log_var_mean=-10.0, log_var_std=0.1):
    """Deterministic re-implementation of init_stochastic_linear."""
    stdv = math.sqrt(1.0 / in_dim)
    k1, k2, k3, k4 = jax.random.split(key, 4)
    w_mu = jax.random.uniform(k1, (out_dim, in_dim), jnp.float32, -stdv, stdv)
    b_mu = jax.random.uniform(k2, (out_dim,), jnp.float32, -stdv, stdv)
    w_log_var = log_var_mean + log_var_std * jax.random.normal(
        k3, (out_dim, in_dim), jnp.float32)
    b_log_var = log_var_mean + log_var_std * jax.random.normal(
        k4, (out_dim,), jnp.float32)
    return w_mu, w_log_var, b_mu, b_log_var


def reference_forward(x, w_mu, w_log_var, b_mu, b_log_var, noise):
    out_mean = x @ w_mu.T + b_mu
    out_var = (x ** 2) @ jnp.exp(w_log_var).T + jnp.exp(b_log_var)
    out_var = jnp.maximum(out_var, 0.0)
    return out_mean + noise * jnp.sqrt(out_var)


def _check(key, B, in_dim, out_dim, eps_std=1.0, *,
           compute_dtype=jnp.float32, atol=1e-5, rtol=1e-5, **tile_kwargs):
    k_param, k_x, k_noise = jax.random.split(key, 3)
    w_mu, w_log_var, b_mu, b_log_var = init_stochastic_linear_params(
        k_param, in_dim, out_dim)
    x = jax.random.normal(k_x, (B, in_dim), jnp.float32)
    noise = eps_std * jax.random.normal(k_noise, (B, out_dim), jnp.float32)

    y = stochastic_linear_forward(x, w_mu, w_log_var, b_mu, b_log_var, noise,
                                  compute_dtype=compute_dtype, **tile_kwargs)
    y = jax.block_until_ready(y)

    y_ref = reference_forward(x, w_mu, w_log_var, b_mu, b_log_var, noise)
    assert y.shape == (B, out_dim)
    assert jnp.allclose(y, y_ref, atol=atol, rtol=rtol), \
        f"mismatch vs reference for B={B}, in={in_dim}, out={out_dim}, dtype={compute_dtype}"


if __name__ == "__main__":
    root = jax.random.PRNGKey(0)
    k_small, k_multi, k_bf16 = jax.random.split(root, 3)

    # Small shape matching the module's toy usage (single grid step), exact f32.
    _check(k_small, B=8, in_dim=32, out_dim=16)

    # Shape forcing a multi-step grid in all three axes (M=3, N=2, K=3 blocks)
    # to exercise padding + init/accumulate/finalize logic. Exact f32.
    _check(k_multi, B=24, in_dim=640, out_dim=200,
           tm_cap=8, tn_cap=128, tk_cap=256)

    # Recommended bf16-feed perf mode (f32 accumulation), looser tolerance.
    _check(k_bf16, B=24, in_dim=640, out_dim=200,
           compute_dtype=jnp.bfloat16, atol=5e-2, rtol=5e-2)

    print("KERNEL_OK")
</pallas_src>

<mosaic_0001>
module attributes {stable_mosaic.version = 11 : i64} {
  func.func @stochastic_linear_kernel(%arg0: i32, %arg1: i32, %arg2: i32, %arg3: memref<8x128xf32, #tpu.memory_space<vmem>>, %arg4: memref<128x128xf32, #tpu.memory_space<vmem>>, %arg5: memref<128x128xf32, #tpu.memory_space<vmem>>, %arg6: memref<1x128xf32, #tpu.memory_space<vmem>>, %arg7: memref<1x128xf32, #tpu.memory_space<vmem>>, %arg8: memref<8x128xf32, #tpu.memory_space<vmem>>, %arg9: memref<8x128xf32, #tpu.memory_space<vmem>>, %arg10: memref<8x128xf32, #tpu.memory_space<vmem>>) attributes {dimension_semantics = [#tpu.dimension_semantics<parallel>, #tpu.dimension_semantics<parallel>, #tpu.dimension_semantics<arbitrary>], iteration_bounds = array<i64: 1, 1, 1>, scalar_prefetch = 0 : i64, scratch_operands = 1 : i64, tpu.core_type = #tpu.core_type<tc>, window_params = [{transform_indices = @transform_0, window_bounds = array<i64: 8, 128>}, {transform_indices = @transform_1, window_bounds = array<i64: 128, 128>}, {transform_indices = @transform_2, window_bounds = array<i64: 128, 128>}, {transform_indices = @transform_3, window_bounds = array<i64: 1, 128>}, {transform_indices = @transform_4, window_bounds = array<i64: 1, 128>}, {transform_indices = @transform_5, window_bounds = array<i64: 8, 128>}, {transform_indices = @transform_6, window_bounds = array<i64: 8, 128>}]} {
    %c0 = arith.constant 0 : index
    %c0_0 = arith.constant 0 : index
    %0 = vector.load %arg3[%c0, %c0_0] : memref<8x128xf32, #tpu.memory_space<vmem>>, vector<8x128xf32>
    %c0_1 = arith.constant 0 : index
    %c0_2 = arith.constant 0 : index
    %1 = vector.load %arg4[%c0_1, %c0_2] : memref<128x128xf32, #tpu.memory_space<vmem>>, vector<128x128xf32>
    %cst = arith.constant dense<0.000000e+00> : vector<8x128xf32>
    %2 = tpu.matmul %0, %1, %cst {dimension_numbers = #tpu.dot_dimension_numbers<[1], [1], [0], [0], [0, 0, 1, 0], [], []>} : vector<8x128xf32>, vector<128x128xf32>, vector<8x128xf32> -> vector<8x128xf32>
    %c0_3 = arith.constant 0 : index
    %c0_4 = arith.constant 0 : index
    %3 = vector.load %arg5[%c0_3, %c0_4] : memref<128x128xf32, #tpu.memory_space<vmem>>, vector<128x128xf32>
    %4 = math.exp %3 : vector<128x128xf32>
    %5 = arith.mulf %0, %0 : vector<8x128xf32>
    %cst_5 = arith.constant dense<0.000000e+00> : vector<8x128xf32>
    %6 = tpu.matmul %5, %4, %cst_5 {dimension_numbers = #tpu.dot_dimension_numbers<[1], [1], [0], [0], [0, 0, 1, 0], [], []>} : vector<8x128xf32>, vector<128x128xf32>, vector<8x128xf32> -> vector<8x128xf32>
    %c0_i32 = arith.constant 0 : i32
    %7 = arith.cmpi eq, %arg2, %c0_i32 : i32
    %8 = arith.extui %7 : i1 to i32
    %c0_i32_6 = arith.constant 0 : i32
    %9 = arith.cmpi ne, %8, %c0_i32_6 : i32
    scf.if %9 {
      %c0_11 = arith.constant 0 : index
      %c0_12 = arith.constant 0 : index
      %16 = vector.load %arg9[%c0_11, %c0_12] : memref<8x128xf32, #tpu.memory_space<vmem>>, vector<8x128xf32>
      tpu.vector_store %arg9[%c0_11, %c0_12], %2 {strides = array<i32>} : memref<8x128xf32, #tpu.memory_space<vmem>>, vector<8x128xf32>,
      %c0_13 = arith.constant 0 : index
      %c0_14 = arith.constant 0 : index
      %17 = vector.load %arg10[%c0_13, %c0_14] : memref<8x128xf32, #tpu.memory_space<vmem>>, vector<8x128xf32>
      tpu.vector_store %arg10[%c0_13, %c0_14], %6 {strides = array<i32>} : memref<8x128xf32, #tpu.memory_space<vmem>>, vector<8x128xf32>,
    } else {
    }
    %c0_i32_7 = arith.constant 0 : i32
    %10 = arith.cmpi sgt, %arg2, %c0_i32_7 : i32
    %11 = arith.extui %10 : i1 to i32
    %c0_i32_8 = arith.constant 0 : i32
    %12 = arith.cmpi ne, %11, %c0_i32_8 : i32
    scf.if %12 {
      %c0_11 = arith.constant 0 : index
      %c0_12 = arith.constant 0 : index
      %16 = vector.load %arg9[%c0_11, %c0_12] : memref<8x128xf32, #tpu.memory_space<vmem>>, vector<8x128xf32>
      %17 = arith.addf %16, %2 : vector<8x128xf32>
      %c0_13 = arith.constant 0 : index
      %c0_14 = arith.constant 0 : index
      %18 = vector.load %arg9[%c0_13, %c0_14] : memref<8x128xf32, #tpu.memory_space<vmem>>, vector<8x128xf32>
      tpu.vector_store %arg9[%c0_13, %c0_14], %17 {strides = array<i32>} : memref<8x128xf32, #tpu.memory_space<vmem>>, vector<8x128xf32>,
      %c0_15 = arith.constant 0 : index
      %c0_16 = arith.constant 0 : index
      %19 = vector.load %arg10[%c0_15, %c0_16] : memref<8x128xf32, #tpu.memory_space<vmem>>, vector<8x128xf32>
      %20 = arith.addf %19, %6 : vector<8x128xf32>
      %c0_17 = arith.constant 0 : index
      %c0_18 = arith.constant 0 : index
      %21 = vector.load %arg10[%c0_17, %c0_18] : memref<8x128xf32, #tpu.memory_space<vmem>>, vector<8x128xf32>
      tpu.vector_store %arg10[%c0_17, %c0_18], %20 {strides = array<i32>} : memref<8x128xf32, #tpu.memory_space<vmem>>, vector<8x128xf32>,
    } else {
    }
    %c0_i32_9 = arith.constant 0 : i32
    %13 = arith.cmpi eq, %arg2, %c0_i32_9 : i32
    %14 = arith.extui %13 : i1 to i32
    %c0_i32_10 = arith.constant 0 : i32
    %15 = arith.cmpi ne, %14, %c0_i32_10 : i32
    scf.if %15 {
      %c0_11 = arith.constant 0 : index
      %c0_12 = arith.constant 0 : index
      %16 = vector.load %arg9[%c0_11, %c0_12] : memref<8x128xf32, #tpu.memory_space<vmem>>, vector<8x128xf32>
      %c0_13 = arith.constant 0 : index
      %c0_14 = arith.constant 0 : index
      %17 = vector.load %arg6[%c0_13, %c0_14] : memref<1x128xf32, #tpu.memory_space<vmem>>, vector<1x128xf32>
      %18 = vector.broadcast %17 : vector<1x128xf32> to vector<8x128xf32>
      %19 = arith.addf %16, %18 : vector<8x128xf32>
      %c0_15 = arith.constant 0 : index
      %c0_16 = arith.constant 0 : index
      %20 = vector.load %arg10[%c0_15, %c0_16] : memref<8x128xf32, #tpu.memory_space<vmem>>, vector<8x128xf32>
      %c0_17 = arith.constant 0 : index
      %c0_18 = arith.constant 0 : index
      %21 = vector.load %arg7[%c0_17, %c0_18] : memref<1x128xf32, #tpu.memory_space<vmem>>, vector<1x128xf32>
      %22 = math.exp %21 : vector<1x128xf32>
      %23 = vector.broadcast %22 : vector<1x128xf32> to vector<8x128xf32>
      %24 = arith.addf %20, %23 : vector<8x128xf32>
      %cst_19 = arith.constant 0.000000e+00 : f32
      %25 = vector.broadcast %cst_19 : f32 to vector<8x128xf32>
      %26 = arith.maximumf %24, %25 : vector<8x128xf32>
      %c0_20 = arith.constant 0 : index
      %c0_21 = arith.constant 0 : index
      %27 = vector.load %arg8[%c0_20, %c0_21] : memref<8x128xf32, #tpu.memory_space<vmem>>, vector<8x128xf32>
      %28 = math.sqrt %26 : vector<8x128xf32>
      %29 = arith.mulf %27, %28 : vector<8x128xf32>
      %30 = arith.addf %19, %29 : vector<8x128xf32>
      %c0_22 = arith.constant 0 : index
      %c0_23 = arith.constant 0 : index
      %31 = vector.load %arg9[%c0_22, %c0_23] : memref<8x128xf32, #tpu.memory_space<vmem>>, vector<8x128xf32>
      tpu.vector_store %arg9[%c0_22, %c0_23], %30 {strides = array<i32>} : memref<8x128xf32, #tpu.memory_space<vmem>>, vector<8x128xf32>,
    } else {
    }
    return
  }
  func.func @transform_0(%arg0: i32, %arg1: i32, %arg2: i32) -> (i32, i32) {
    %c0_i32 = arith.constant 0 : i32
    return %arg0, %arg2 : i32, i32
  }
  func.func @transform_1(%arg0: i32, %arg1: i32, %arg2: i32) -> (i32, i32) {
    %c0_i32 = arith.constant 0 : i32
    return %arg1, %arg2 : i32, i32
  }
  func.func @transform_2(%arg0: i32, %arg1: i32, %arg2: i32) -> (i32, i32) {
    %c0_i32 = arith.constant 0 : i32
    return %arg1, %arg2 : i32, i32
  }
  func.func @transform_3(%arg0: i32, %arg1: i32, %arg2: i32) -> (i32, i32) {
    %c0_i32 = arith.constant 0 : i32
    %c0_i32_0 = arith.constant 0 : i32
    return %c0_i32, %arg1 : i32, i32
  }
  func.func @transform_4(%arg0: i32, %arg1: i32, %arg2: i32) -> (i32, i32) {
    %c0_i32 = arith.constant 0 : i32
    %c0_i32_0 = arith.constant 0 : i32
    return %c0_i32, %arg1 : i32, i32
  }
  func.func @transform_5(%arg0: i32, %arg1: i32, %arg2: i32) -> (i32, i32) {
    %c0_i32 = arith.constant 0 : i32
    return %arg0, %arg1 : i32, i32
  }
  func.func @transform_6(%arg0: i32, %arg1: i32, %arg2: i32) -> (i32, i32) {
    %c0_i32 = arith.constant 0 : i32
    return %arg0, %arg1 : i32, i32
  }
}

</mosaic_0001>

<bundles_post_ra>
// kernel: tpu_custom_call.1
= control target key start
LH: loop header
LB: loop body
LE: loop exit
PB: predicated region body
PF: predicated region fallthrough
CT: control target
= control target key end

     0   :  { %11 = vsyncpa [#allocation4], 0  ;;  %s751_s0 = inlined_call_operand.hbm [shape: f32[8,128], index: 0, kind: input, shape index: {}]   ;;  %s752_s1 = inlined_call_operand.hbm [shape: f32[128,128], index: 1, kind: input, shape index: {}]   ;;  %s753_s2 = inlined_call_operand.hbm [shape: f32[128,128], index: 2, kind: input, shape index: {}]   ;;  %s754_s3 = inlined_call_operand.vmem [shape: f32[1,128], index: 3, kind: input, shape index: {}]   ;;  %s755_s4 = inlined_call_operand.vmem [shape: f32[1,128], index: 4, kind: input, shape index: {}]   ;;  %s756_s5 = inlined_call_operand.vmem [shape: f32[8,128], index: 5, kind: input, shape index: {}]   ;;  %s757_s6 = inlined_call_operand.hbm [shape: f32[8,128], index: 6, kind: output, shape index: {}]  }
   0x1   :  { %12 = vsyncpa [#allocation7], 0 }
   0x2   :  { %13 = vsyncpa [#allocation5], 0  ;;  %s628_s21 = smov [#allocation6]   ;;  %s534_s25 = scalar_lea.hbm %s752_s1, 2048 }
   0x3   :  { %s29_s22 = sshll.u32 %s628_s21, 4  ;;  %p535_p0 = scmp.ne.s32.totalorder %s752_s1, %s534_s25  ;;  %s30_s22 = int_to_ptr.vmem [resolvable:$true] %s29_s22 }
   0x4   :  { %p538_p1 = scmp.lt.u32.totalorder %s534_s25, %s752_s1 }
   0x6   :  { %p540_p2 = pnand %p538_p1, %p535_p0 }
   0x8   :  { %543 = shalt.err (!%p540_p2)
}
   0x9   :  { %s544_s30 = scalar_lea.vmem %s30_s22, 2048  ;;  %p549_p4 = scmp.lt.s32.totalorder %s30_s22, %s30_s22 }
   0xa   :  { %p545_p3 = scmp.ne.s32.totalorder %s30_s22, %s544_s30  ;;  %p550_p5 = scmp.lt.s32.totalorder %s544_s30, %s544_s30 }
   0xc   :  { %p551_p6 = por %p550_p5, %p549_p4 }
   0xe   :  { %p552_p7 = pnand %p551_p6, %p545_p3 }
  0x10   :  { %555 = shalt.err (!%p552_p7)
}
  0x11   :  { %s629_s7 = smov 128   ;;  %s630_s8 = smov 8  }
  0x12   :  { %35 = dma.hbm_to_vmem [thread:$0]  %s752_s1, 2048, %s30_s22, [#allocation7], %s629_s7, %s629_s7, %s630_s8  }
  0x13   :  { %s631_s11 = smov [#allocation3]   ;;  %s632_s13 = smov [#allocation8]  }
  0x14   :  { %s20_s12 = sshll.u32 %s631_s11, 4  ;;  %s41_s14 = sshll.u32 %s632_s13, 4  ;;  %s21_s12 = int_to_ptr.vmem [resolvable:$true] %s20_s12  ;;  %s42_s14 = int_to_ptr.vmem [resolvable:$true] %s41_s14 }
  0x15   :  { %s556_s17 = scalar_lea.hbm %s751_s0, 128 }
  0x16   :  { %p557_p8 = scmp.ne.s32.totalorder %s751_s0, %s556_s17  ;;  %p560_p9 = scmp.lt.u32.totalorder %s556_s17, %s751_s0 }
  0x18   :  { %p562_p10 = pnand %p560_p9, %p557_p8 }
  0x1a   :  { %565 = shalt.err (!%p562_p10)
}
  0x1b   :  { %s566_s1 = scalar_lea.vmem %s21_s12, 128  ;;  %p571_p12 = scmp.lt.s32.totalorder %s21_s12, %s21_s12 }
  0x1c   :  { %p567_p11 = scmp.ne.s32.totalorder %s21_s12, %s566_s1  ;;  %p572_p13 = scmp.lt.s32.totalorder %s566_s1, %s566_s1 }
  0x1e   :  { %p573_p0 = por %p572_p13, %p571_p12 }
  0x20   :  { %p574_p1 = pnand %p573_p0, %p567_p11 }
  0x22   :  { %577 = shalt.err (!%p574_p1)
}
  0x23   :  { %23 = dma.hbm_to_vmem [thread:$0]  %s751_s0, 128, %s21_s12, [#allocation4]  }
  0x24   :  { %s578_s26 = scalar_lea.hbm %s753_s2, 2048 }
  0x25   :  { %p579_p2 = scmp.ne.s32.totalorder %s753_s2, %s578_s26  ;;  %p582_p3 = scmp.lt.u32.totalorder %s578_s26, %s753_s2 }
  0x27   :  { %p584_p4 = pnand %p582_p3, %p579_p2 }
  0x29   :  { %587 = shalt.err (!%p584_p4)
}
  0x2a   :  { %s588_s9 = scalar_lea.vmem %s42_s14, 2048  ;;  %p593_p6 = scmp.lt.s32.totalorder %s42_s14, %s42_s14 }
  0x2b   :  { %p589_p5 = scmp.ne.s32.totalorder %s42_s14, %s588_s9  ;;  %p594_p7 = scmp.lt.s32.totalorder %s588_s9, %s588_s9 }
  0x2d   :  { %p595_p8 = por %p594_p7, %p593_p6 }
  0x2f   :  { %p596_p9 = pnand %p595_p8, %p589_p5 }
  0x31   :  { %599 = shalt.err (!%p596_p9)
}
  0x32   :  { %47 = dma.hbm_to_vmem [thread:$0]  %s753_s2, 2048, %s42_s14, [#allocation7], %s629_s7, %s629_s7, %s630_s8  }
  0x33   :  { %622 = dma.done.wait [#allocation4], 128  }
  0x34   :  { %623 = vsyncadd [#allocation4], 4294967168 }
  0x35   :  { %624 = dma.done.wait [#allocation7], 4096  }
  0x36   :  { %625 = vsyncadd [#allocation7], 4294963200  ;;  %v633_v0 = vmov 0.0|0.0   ;;  %vm634_vm0 = vmmov 0   ;;  %v635_v1 = vmov 0.0   ;;  %v150_v2 = vld [vmem:[#allocation8] sm:$0xff] }
  0x37   :  { %465 = vmatprep.subr.bf16.mxu1 %v633_v0  ;;  %441 = vmatprep.subr.bf16.mxu0 %v633_v0  ;;  %v151_v3 = vld [vmem:[#allocation8 + $0x8] sm:$0xff]  ;;  %v152_v4 = vld [vmem:[#allocation8 + $0x10] sm:$0xff]  ;;  %v166_v5 = vmul.f32 1.442695, %v150_v2  ;;  %v153_v7 = vld [vmem:[#allocation8 + $0x18] sm:$0xff]  ;;  %s636_s13 = smov [#allocation9]  }
  0x38   :  { %438 = vmatprep.mubr.msk.f32.mxu1 %vm634_vm0, %v635_v1  ;;  %403 = vmatprep.mubr.msk.f32.mxu0 %vm634_vm0, %v635_v1  ;;  %v168_v6 = vmul.f32 1.442695, %v151_v3  ;;  %v64_v8 = vld [vmem:[#allocation6] sm:$0xff]  ;;  %v65_v9 = vld [vmem:[#allocation6 + $0x8] sm:$0xff]  ;;  %v170_v10 = vmul.f32 1.442695, %v152_v4 }
  0x39   :  { %498 = vpow2.f32 %v166_v5  ;;  %v442_v11 = vpack.c.bf16 %v65_v9, %v64_v8  ;;  %v172_v12 = vmul.f32 1.442695, %v153_v7  ;;  %v66_v13 = vld [vmem:[#allocation6 + $0x10] sm:$0xff]  ;;  %v67_v14 = vld [vmem:[#allocation6 + $0x18] sm:$0xff]  ;;  %v154_v15 = vld [vmem:[#allocation8 + $0x20] sm:$0xff]  ;;  %s326_s14 = sshll.u32 %s636_s13, 4  ;;  %s327_s14 = int_to_ptr.vmem [resolvable:$true] %s326_s14 }
  0x3a   :  { %500 = vpow2.f32 %v168_v6  ;;  %v155_v16 = vld [vmem:[#allocation8 + $0x28] sm:$0xff]  ;;  %v445_v17 = vpack.c.bf16 %v67_v14, %v66_v13  ;;  %v174_v18 = vmul.f32 1.442695, %v154_v15  ;;  %v68_v22 = vld [vmem:[#allocation6 + $0x20] sm:$0xff]  ;;  %v156_v25 = vld [vmem:[#allocation8 + $0x30] sm:$0xff]  ;;  %s600_s15 = scalar_lea.vmem %s327_s14, 128  ;;  %p605_p11 = scmp.lt.s32.totalorder %s327_s14, %s327_s14 }
  0x3b   :  { %443 = vmatpush3.bf16.xpose.msra.mxu0 %v442_v11  ;;  %502 = vpow2.f32 %v170_v10  ;;  %v176_v19 = vmul.f32 1.442695, %v155_v16  ;;  %v69_v23 = vld [vmem:[#allocation6 + $0x28] sm:$0xff]  ;;  %v157_v27 = vld [vmem:[#allocation8 + $0x38] sm:$0xff]  ;;  %v178_v30 = vmul.f32 1.442695, %v156_v25  ;;  %p601_p10 = scmp.ne.s32.totalorder %s327_s14, %s600_s15  ;;  %p606_p12 = scmp.lt.s32.totalorder %s600_s15, %s600_s15 }
  0x3c   :  { %444 = vmatprep.subr.bf16.mxu0 %v633_v0  ;;  %504 = vpow2.f32 %v172_v12  ;;  %v448_v28 = vpack.c.bf16 %v69_v23, %v68_v22  ;;  %v180_v31 = vmul.f32 1.442695, %v157_v27  ;;  %v70_v33 = vld [vmem:[#allocation6 + $0x30] sm:$0xff]  ;;  %v71_v34 = vld [vmem:[#allocation6 + $0x38] sm:$0xff]  ;;  %v158_v35 = vld [vmem:[#allocation8 + $0x40] sm:$0xff]  ;;  %v302_v23 = vlaneseq }
  0x3d   :  { %506 = vpow2.f32 %v174_v18  ;;  %v159_v37 = vld [vmem:[#allocation8 + $0x48] sm:$0xff]  ;;  %v451_v38 = vpack.c.bf16 %v71_v34, %v70_v33  ;;  %v182_v40 = vmul.f32 1.442695, %v158_v35  ;;  %v72_v43 = vld [vmem:[#allocation6 + $0x40] sm:$0xff]  ;;  %v160_v45 = vld [vmem:[#allocation8 + $0x50] sm:$0xff]  ;;  %p607_p13 = por %p606_p12, %p605_p11 }
  0x3e   :  { %508 = vpow2.f32 %v176_v19  ;;  %v184_v41 = vmul.f32 1.442695, %v159_v37  ;;  %v73_v44 = vld [vmem:[#allocation6 + $0x48] sm:$0xff]  ;;  %v161_v47 = vld [vmem:[#allocation8 + $0x58] sm:$0xff]  ;;  %v186_v50 = vmul.f32 1.442695, %v160_v45 }
  0x3f   :  { %510 = vpow2.f32 %v178_v30  ;;  %v454_v48 = vpack.c.bf16 %v73_v44, %v72_v43  ;;  %v188_v51 = vmul.f32 1.442695, %v161_v47  ;;  %v74_v53 = vld [vmem:[#allocation6 + $0x50] sm:$0xff]  ;;  %v75_v54 = vld [vmem:[#allocation6 + $0x58] sm:$0xff]  ;;  %v162_v55 = vld [vmem:[#allocation8 + $0x60] sm:$0xff]  ;;  %v303_v25 = vshrl.u32 %v302_v23, 7  ;;  %p608_p0 = pnand %p607_p13, %p601_p10 }
  0x40   :  { %512 = vpow2.f32 %v180_v31  ;;  %v163_v57 = vld [vmem:[#allocation8 + $0x68] sm:$0xff]  ;;  %v457_v58 = vpack.c.bf16 %v75_v54, %v74_v53  ;;  %v190_v60 = vmul.f32 1.442695, %v162_v55  ;;  %v76_v63 = vld [vmem:[#allocation6 + $0x60] sm:$0xff]  ;;  %v164_v2 = vld [vmem:[#allocation8 + $0x70] sm:$0xff] }
  0x41   :  { %514 = vpow2.f32 %v182_v40  ;;  %v192_v61 = vmul.f32 1.442695, %v163_v57  ;;  %v77_v1 = vld [vmem:[#allocation6 + $0x68] sm:$0xff]  ;;  %v165_v4 = vld [vmem:[#allocation8 + $0x78] sm:$0xff]  ;;  %v194_v7 = vmul.f32 1.442695, %v164_v2 }
  0x42   :  { %516 = vpow2.f32 %v184_v41  ;;  %v460_v5 = vpack.c.bf16 %v77_v1, %v76_v63  ;;  %v196_v8 = vmul.f32 1.442695, %v165_v4  ;;  %v78_v10 = vld [vmem:[#allocation6 + $0x70] sm:$0xff]  ;;  %v79_v11 = vld [vmem:[#allocation6 + $0x78] sm:$0xff]  ;;  %v304_v27 = vsub.s32 0, %v303_v25 }
  0x43   :  { %v499_v20 = vpop.eup %498  ;;  %446 = vmatpush3.bf16.xpose.msra.mxu0 %v445_v17  ;;  %518 = vpow2.f32 %v186_v50  ;;  %v463_v13 = vpack.c.bf16 %v79_v11, %v78_v10  ;;  %v63_v18 = vld [vmem:[#allocation3] sm:$0xff] }
  0x44   :  { %v501_v21 = vpop.eup %500  ;;  %447 = vmatprep.subr.bf16.mxu0 %v633_v0  ;;  %520 = vpow2.f32 %v188_v51  ;;  %v336_v34 = vld [vmem:[%s754_s3] ss:$0 sm:$0xff] }
  0x45   :  { %v466_v24 = vpack.c.bf16 %v501_v21, %v499_v20  ;;  %v503_v26 = vpop.eup %502  ;;  %522 = vpow2.f32 %v190_v60  ;;  %v198_v20 = vmul.f32 %v63_v18, %v63_v18  ;;  %v298_v21 = vld [vmem:[%s755_s4] sm:$0x1] }
  0x46   :  { %v505_v29 = vpop.eup %504  ;;  %524 = vpow2.f32 %v192_v61  ;;  %v299_v22 = vmul.f32 1.442695, %v298_v21 }
  0x47   :  { %467 = vmatpush3.bf16.xpose.msra.mxu1 %v466_v24  ;;  %v469_v32 = vpack.c.bf16 %v505_v29, %v503_v26  ;;  %v507_v36 = vpop.eup %506  ;;  %526 = vpow2.f32 %v194_v7 }
  0x48   :  { %468 = vmatprep.subr.bf16.mxu1 %v633_v0  ;;  %v509_v39 = vpop.eup %508  ;;  %528 = vpow2.f32 %v196_v8 }
  0x49   :  { %v472_v42 = vpack.c.bf16 %v509_v39, %v507_v36  ;;  %v511_v46 = vpop.eup %510  ;;  %530 = vpow2.f32 %v299_v22  ;;  %v309_v36 = vld [vmem:[%s756_s5] sm:$0xff] }
  0x4a   :  { %v513_v49 = vpop.eup %512 }
  0x4b   :  { %449 = vmatpush3.bf16.xpose.msra.mxu0 %v448_v28  ;;  %v475_v52 = vpack.c.bf16 %v513_v49, %v511_v46  ;;  %v515_v56 = vpop.eup %514 }
  0x4c   :  { %450 = vmatprep.subr.bf16.mxu0 %v633_v0  ;;  %v517_v59 = vpop.eup %516 }
  0x4d   :  { %v478_v62 = vpack.c.bf16 %v517_v59, %v515_v56  ;;  %v519_v3 = vpop.eup %518 }
  0x4e   :  { %v521_v6 = vpop.eup %520 }
  0x4f   :  { %470 = vmatpush3.bf16.xpose.msra.mxu1 %v469_v32  ;;  %v481_v9 = vpack.c.bf16 %v521_v6, %v519_v3  ;;  %v523_v12 = vpop.eup %522 }
  0x50   :  { %471 = vmatprep.subr.bf16.mxu1 %v633_v0  ;;  %v525_v14 = vpop.eup %524 }
  0x51   :  { %v484_v15 = vpack.c.bf16 %v525_v14, %v523_v12  ;;  %v527_v16 = vpop.eup %526 }
  0x52   :  { %v529_v17 = vpop.eup %528 }
  0x53   :  { %452 = vmatpush3.bf16.xpose.msra.mxu0 %v451_v38  ;;  %v487_v19 = vpack.c.bf16 %v529_v17, %v527_v16  ;;  %v531_v28 = vpop.eup %530 }
  0x54   :  { %453 = vmatprep.subr.bf16.mxu0 %v633_v0  ;;  %v305_v29 = vrot.slane %v531_v28, %v304_v27 }
  0x57   :  { %473 = vmatpush3.bf16.xpose.msra.mxu1 %v472_v42 }
  0x58   :  { %474 = vmatprep.subr.bf16.mxu1 %v633_v0 }
  0x5b   :  { %455 = vmatpush3.bf16.xpose.msra.mxu0 %v454_v48 }
  0x5c   :  { %456 = vmatprep.subr.bf16.mxu0 %v633_v0 }
  0x5f   :  { %476 = vmatpush3.bf16.xpose.msra.mxu1 %v475_v52 }
  0x60   :  { %477 = vmatprep.subr.bf16.mxu1 %v633_v0 }
  0x63   :  { %458 = vmatpush3.bf16.xpose.msra.mxu0 %v457_v58 }
  0x64   :  { %459 = vmatprep.subr.bf16.mxu0 %v633_v0 }
  0x67   :  { %479 = vmatpush3.bf16.xpose.msra.mxu1 %v478_v62 }
  0x68   :  { %480 = vmatprep.subr.bf16.mxu1 %v633_v0 }
  0x6b   :  { %461 = vmatpush3.bf16.xpose.msra.mxu0 %v460_v5 }
  0x6c   :  { %462 = vmatprep.subr.bf16.mxu0 %v633_v0 }
  0x6f   :  { %482 = vmatpush3.bf16.xpose.msra.mxu1 %v481_v9 }
  0x70   :  { %483 = vmatprep.subr.bf16.mxu1 %v633_v0 }
  0x73   :  { %464 = vmatpush3.bf16.xpose.msra.mxu0 %v463_v13 }
  0x77   :  { %485 = vmatpush3.bf16.xpose.msra.mxu1 %v484_v15 }
  0x78   :  { %486 = vmatprep.subr.bf16.mxu1 %v633_v0 }
  0x7a   :  { %404 = vmatmul.mubr.f32.vlgmr.msra.gmra.mrb[0].mxu0 %v63_v18 }
  0x7f   :  { %488 = vmatpush3.bf16.xpose.msra.mxu1 %v487_v19 }
  0x86   :  { %439 = vmatmul.mubr.f32.vlgmr.msra.gmra.mrb[0].mxu1 %v198_v20 }
 0x14d   :  { %v146_v24 = vpop.f32.mrb[0].mxu0 }
 0x14e   :  { %v405_v26 = vpop.f32.mrb[1].mxu0  ;;  %v296_v38 = vadd.f32 %v336_v34, %v146_v24 }
 0x159   :  { %v265_v0 = vpop.f32.mrb[0].mxu1 }
 0x15a   :  { %v307_v30 = vadd.f32 %v305_v29, %v265_v0  ;;  %v440_v31 = vpop.f32.mrb[1].mxu1 }
 0x15c   :  { %v308_v32 = vmax.f32 %v307_v30, 0.0 }
 0x15e   :  { %532 = vrsqrt.f32 %v308_v32  ;;  %vm312_vm1 = vcmp.eq.f32.partialorder %v308_v32, inf  ;;  %v315_v37 = vand.u32 2147483648, %v308_v32  ;;  %vm314_vm2 = vcmp.eq.f32.partialorder %v308_v32, 0.0 }
 0x168   :  { %v533_v33 = vpop.eup %532 }
 0x169   :  { %v311_v35 = vmul.f32 %v533_v33, %v308_v32 }
 0x16b   :  { %v313_v39 = vsel %vm312_vm1, %v308_v32, %v311_v35 }
 0x16c   :  { %v316_v40 = vsel %vm314_vm2, %v315_v37, %v313_v39 }
 0x16d   :  { %v317_v41 = vmul.f32 %v316_v40, %v309_v36 }
 0x16f   :  { %v318_v42 = vadd.f32 %v317_v41, %v296_v38 }
 0x171   :  { %319 = vst [vmem:[#allocation9] sm:$0xff] %v318_v42 }
 0x172   :  { %611 = shalt.err (!%p608_p0)
}
 0x173   :  { %s612_s16 = scalar_lea.hbm %s757_s6, 128 }
 0x174   :  { %p613_p1 = scmp.ne.s32.totalorder %s757_s6, %s612_s16  ;;  %p616_p2 = scmp.lt.u32.totalorder %s612_s16, %s757_s6 }
 0x176   :  { %p618_p3 = pnand %p616_p2, %p613_p1 }
 0x178   :  { %621 = shalt.err (!%p618_p3)
}
 0x179   :  { %329 = dma.vmem_to_hbm [thread:$0]  %s327_s14, 128, %s757_s6, [#allocation5]  }
 0x17a   :  { %626 = dma.done.wait [#allocation5], 128  }
 0x17b   :  { %627 = vsyncadd [#allocation5], 4294967168 }
 0x17c   :  { %333 = vsyncpa [#allocation4], 1 }
 0x17d   :  { %334 = vsyncpa [#allocation7], 1 }
 0x17e   :  { %335 = vsyncpa [#allocation5], 1 }

</bundles_post_ra>
